<compile_context>
chip_gen: v7x
topology: tpu7x:2x2x1
jax: 0.10.0
libtpu: 0.0.40
codegen_flags: <defaults>
</compile_context>

<pallas_src>
import functools

import jax
import jax.numpy as jnp
from jax.experimental import pallas as pl
from jax.experimental.pallas import tpu as pltpu

LANES = 128


def _round_up(x: int, m: int) -> int:
    return ((x + m - 1) // m) * m


def _sublane_multiple(dtype) -> int:
    """Native sublane packing granularity for the dtype (8/16/32 rows)."""
    itemsize = jnp.dtype(dtype).itemsize
    return max(8, 32 // max(itemsize, 1))


def _smelu_kernel(x_ref, o_ref, *, beta: float, inv_4beta: float):
    x = x_ref[...]
    # quadratic middle section: (x + beta)^2 / (4*beta)
    quad = (x + beta) * (x + beta) * inv_4beta
    out = jnp.where(x >= beta, x, jnp.zeros_like(x))
    out = jnp.where(jnp.abs(x) <= beta, quad, out)
    o_ref[...] = out.astype(o_ref.dtype)


def smelu(x: jax.Array, beta: float = 2.0, *, row_tile: int = 4096,
          donate_input: bool = False) -> jax.Array:
    """Apply SmeLU elementwise to a tensor of any shape via a Pallas kernel."""
    assert beta >= 0.0, f"Beta must be >= 0. beta={beta} given."
    orig_shape = x.shape
    dtype = x.dtype
    n = x.size
    if n == 0:
        return x

    sub = _sublane_multiple(dtype)
    row_tile = max(sub, _round_up(int(row_tile), sub))

    # Lane-align: only non-128-aligned sizes pay a tiny (<128 elem) pad.
    pad = (-n) % LANES
    if pad:
        flat = jnp.pad(x.reshape(-1), (0, pad))
    else:
        flat = x.reshape(-1)
    rows = flat.shape[0] // LANES
    x2d = flat.reshape(rows, LANES)

    # Tile selection: big tiles, ragged last block handled by Pallas via cdiv.
    if rows <= sub:
        tile = rows                       # block == full dim (always legal)
    else:
        # cap so we get >=2 grid programs when possible (v7x megacore), but
        # never below the dtype's native sublane multiple.
        tile = min(row_tile, _round_up(pl.cdiv(rows, 2), sub))
    grid = (pl.cdiv(rows, tile),)

    # Safe even for beta == 0 (SmeLU degenerates to ReLU; no inf/NaN).
    inv_4beta = (0.25 / float(beta)) if beta > 0.0 else 0.0
    kernel = functools.partial(_smelu_kernel, beta=float(beta),
                               inv_4beta=inv_4beta)

    out2d = pl.pallas_call(
        kernel,
        out_shape=jax.ShapeDtypeStruct((rows, LANES), dtype),
        grid_spec=pltpu.PrefetchScalarGridSpec(
            num_scalar_prefetch=0,
            grid=grid,
            in_specs=[pl.BlockSpec((tile, LANES), lambda i: (i, 0))],
            out_specs=pl.BlockSpec((tile, LANES), lambda i: (i, 0)),
        ),
        compiler_params=pltpu.CompilerParams(
            dimension_semantics=("parallel",),
            vmem_limit_bytes=32 * 1024 * 1024,
        ),
        input_output_aliases=({0: 0} if donate_input else {}),
    )(x2d)

    out_flat = out2d.reshape(-1)
    if pad:
        out_flat = out_flat[:n]
    return out_flat.reshape(orig_shape)


def smelu_ref(x: jax.Array, beta: float = 2.0) -> jax.Array:
    """Pure-JAX reference (mirrors the torch forward)."""
    if beta == 0.0:
        return jnp.maximum(x, jnp.zeros_like(x))
    inv_4beta = 0.25 / float(beta)
    out = jnp.where(x >= beta, x, jnp.zeros_like(x))
    out = jnp.where(jnp.abs(x) <= beta, (x + beta) * (x + beta) * inv_4beta, out)
    return out


if __name__ == "__main__":
    key = jax.random.PRNGKey(0)
    k1, k2, k3 = jax.random.split(key, 3)

    # 1) main NCHW-like f32 input spanning the three SmeLU regions
    x = jax.random.normal(k1, (2, 4, 16, 16), dtype=jnp.float32) * 4.0
    beta = 2.0
    y = jax.block_until_ready(smelu(x, beta=beta))
    assert y.shape == x.shape and y.dtype == x.dtype
    assert jnp.allclose(y, smelu_ref(x, beta=beta), atol=1e-6, rtol=1e-6)

    # 2) awkward (non-lane-aligned) shape: exercises tiny-pad + ragged grid
    xb = jax.random.normal(k2, (3, 5, 7, 11), dtype=jnp.float32) * 3.0
    yb = jax.block_until_ready(smelu(xb, beta=1.0))
    assert yb.shape == xb.shape
    assert jnp.allclose(yb, smelu_ref(xb, beta=1.0), atol=1e-6, rtol=1e-6)

    # 3) bf16 input: dtype-aware sublane granularity path
    xc = (jax.random.normal(k3, (2, 4, 16, 16), dtype=jnp.float32) * 4.0
          ).astype(jnp.bfloat16)
    yc = jax.block_until_ready(smelu(xc, beta=beta))
    assert yc.dtype == jnp.bfloat16
    assert jnp.allclose(yc.astype(jnp.float32),
                        smelu_ref(xc, beta=beta).astype(jnp.float32),
                        atol=5e-2, rtol=5e-2)

    # 4) beta == 0 degenerates to ReLU without NaNs
    y0 = jax.block_until_ready(smelu(x, beta=0.0))
    assert jnp.allclose(y0, jnp.maximum(x, 0.0), atol=1e-6, rtol=1e-6)

    print("KERNEL_OK")
</pallas_src>

<mosaic_0001>
module attributes {stable_mosaic.version = 11 : i64} {
  func.func @_smelu_kernel(%arg0: i32, %arg1: memref<8x128xf32, #tpu.memory_space<vmem>>, %arg2: memref<8x128xf32, #tpu.memory_space<vmem>>) attributes {dimension_semantics = [#tpu.dimension_semantics<parallel>], iteration_bounds = array<i64: 2>, scalar_prefetch = 0 : i64, scratch_operands = 0 : i64, tpu.core_type = #tpu.core_type<tc>, window_params = [{transform_indices = @transform_0, window_bounds = array<i64: 8, 128>}, {transform_indices = @transform_1, window_bounds = array<i64: 8, 128>}]} {
    %c0 = arith.constant 0 : index
    %c0_0 = arith.constant 0 : index
    %0 = vector.load %arg1[%c0, %c0_0] : memref<8x128xf32, #tpu.memory_space<vmem>>, vector<8x128xf32>
    %cst = arith.constant 2.000000e+00 : f32
    %1 = vector.broadcast %cst : f32 to vector<8x128xf32>
    %2 = arith.addf %0, %1 : vector<8x128xf32>
    %cst_1 = arith.constant 2.000000e+00 : f32
    %3 = vector.broadcast %cst_1 : f32 to vector<8x128xf32>
    %4 = arith.addf %0, %3 : vector<8x128xf32>
    %5 = arith.mulf %2, %4 : vector<8x128xf32>
    %cst_2 = arith.constant 1.250000e-01 : f32
    %6 = vector.broadcast %cst_2 : f32 to vector<8x128xf32>
    %7 = arith.mulf %5, %6 : vector<8x128xf32>
    %cst_3 = arith.constant 2.000000e+00 : f32
    %8 = vector.broadcast %cst_3 : f32 to vector<8x128xf32>
    %9 = arith.cmpf oge, %0, %8 : vector<8x128xf32>
    %cst_4 = arith.constant 0.000000e+00 : f32
    %10 = vector.broadcast %cst_4 : f32 to vector<8x128xf32>
    %11 = arith.select %9, %0, %10 : vector<8x128xi1>, vector<8x128xf32>
    %12 = math.absf %0 : vector<8x128xf32>
    %cst_5 = arith.constant 2.000000e+00 : f32
    %13 = vector.broadcast %cst_5 : f32 to vector<8x128xf32>
    %14 = arith.cmpf ole, %12, %13 : vector<8x128xf32>
    %15 = arith.select %14, %7, %11 : vector<8x128xi1>, vector<8x128xf32>
    %c0_6 = arith.constant 0 : index
    %c0_7 = arith.constant 0 : index
    %16 = vector.load %arg2[%c0_6, %c0_7] : memref<8x128xf32, #tpu.memory_space<vmem>>, vector<8x128xf32>
    tpu.vector_store %arg2[%c0_6, %c0_7], %15 {strides = array<i32>} : memref<8x128xf32, #tpu.memory_space<vmem>>, vector<8x128xf32>,
    return
  }
  func.func @transform_0(%arg0: i32) -> (i32, i32) {
    %c0_i32 = arith.constant 0 : i32
    %c0_i32_0 = arith.constant 0 : i32
    return %arg0, %c0_i32 : i32, i32
  }
  func.func @transform_1(%arg0: i32) -> (i32, i32) {
    %c0_i32 = arith.constant 0 : i32
    %c0_i32_0 = arith.constant 0 : i32
    return %arg0, %c0_i32 : i32, i32
  }
}

</mosaic_0001>

<bundles_post_ra>
// kernel: tpu_custom_call.1
= control target key start
LH: loop header
LB: loop body
LE: loop exit
PB: predicated region body
PF: predicated region fallthrough
CT: control target
= control target key end

     0   :  { %6 = vsyncpa [#allocation3], 0  ;;  %s555_s0 = inlined_call_operand.hbm [shape: f32[16,128], index: 0, kind: input, shape index: {}]   ;;  %s556_s1 = inlined_call_operand.hbm [shape: f32[16,128], index: 1, kind: output, shape index: {}]  }
   0x1   :  { %8 = vsyncpa [#allocation3 + $0x1], 0 }
   0x2   :  { %9 = vsyncpa [#allocation4], 0 }
   0x3   :  { %11 = vsyncpa [#allocation4 + $0x1], 0  ;;  %s394_s6 = smov 0   ;;  %s396_s7 = smov 0  }
   0x4   :  { %s398_s8 = smov 0   ;;  %s400_s9 = smov 0  }
   0x5 LB: > { %s415_s10 = sadd.s32 4294967295, %s380_s9   ;;  %s226_s11 = sadd.s32 4294967294, %s380_s9   ;;  %s380_s9 = sphi %s400_s9, %s571_s9   ;;  %s376_s8 = sphi %s398_s8, %s570_s8   ;;  %s372_s7 = sphi %s396_s7, %s569_s7   ;;  %s368_s6 = sphi %s394_s6, %s568_s6  }
   0x6   : > { %s419_s12 = sadd.s32 1, %s380_s9   ;;  %s24_s13 = sadd.s32 1, %s376_s8 }
   0x7   : > { %s21_s14 = ssub.s32 %s380_s9, %s419_s12  ;;  %p31_p0 = scmp.ne.s32.totalorder %s376_s8, %s372_s7 }
   0x8   : > { %p22_p1 = scmp.eq.s32.totalorder %s21_s14, 0  ;;  %p32_p2 = scmp.eq.s32.totalorder %s380_s9, 0 }
   0x9   : > { %p37_p3 = scmp.ne.s32.totalorder %s372_s7, %s368_s6  ;;  %p38_p4 = scmp.eq.s32.totalorder %s415_s10, 0 }
   0xa   : > { %s431_s15 = scalar_select %p22_p1, %s376_s8, %s24_s13  }
   0xb   : > { %p433_p5 = por %p32_p2, %p31_p0  ;;  %p437_p6 = por %p38_p4, %p37_p3 }
   0xc   : > { %p61_p7 = scmp.eq.s32.totalorder %s415_s10, 1  ;;  %p67_p8 = scmp.eq.s32.totalorder %s226_s11, 1 }
   0xd   : > { %p250_p10 = scmp.lt.s32.totalorder %s380_s9, 2  ;;  %s87_s20 = sand.u32 1, %s376_s8  }
   0xe   : > { %p444_p11 = por %p61_p7, %p31_p0  ;;  %p448_p12 = por %p67_p8, %p37_p3 }
   0xf   : > { %s230_s21 = sshll.u32 %s380_s9, 7  ;;  %s229_s22 = sshll.u32 %s87_s20, 3 }
  0x10   : > { %s560_s18 = scalar_select %p444_p11, 1, 0 }
  0x11   : > { %s561_s19 = scalar_select %p448_p12, 1, 0 }
  0x12   : > { %s457_s25 = scalar_lea.hbm %s555_s0, %s230_s21  ;;  %s91_s26 = scalar_lea.vmem [#allocation2], %s229_s22 }
  0x13   : > { %s98_s27 = sshll.u32 %s91_s26, 4  ;;  %p461_p13 = pnand %p250_p10, %p433_p5  ;;  %s465_s27 = int_to_ptr.vmem [resolvable:$true] %s98_s27 }
  0x14   : > { %s88_s29 = scalar_lea.sflag [#allocation3], %s87_s20  ;;  %s284_s30 = scalar_lea.hbm %s457_s25, 128 }
  0x15   : > { %p285_p2 = scmp.ne.s32.totalorder %s457_s25, %s284_s30  ;;  %p286_p3 = pneg %p461_p13 }
  0x16   : > { %s289_s4 = scalar_lea.hbm %s555_s0, 256  ;;  %p290_p5 = scmp.lt.u32.totalorder %s457_s25, %s555_s0 }
  0x17   : > { %p287_p4 = pnand %p286_p3, %p285_p2  ;;  %p291_p8 = scmp.lt.u32.totalorder %s289_s4, %s284_s30 }
  0x18   : > { %p293_p9 = scmp.lt.u32.totalorder %s284_s30, %s457_s25 }
  0x19   : > { %p288_p7 = pneg %p287_p4  ;;  %p292_p10 = por %p291_p8, %p290_p5 }
  0x1b   : > { %p294_p0 = por %p293_p9, %p292_p10 }
  0x1d   : > { %p295_p1 = pnand %p294_p0, %p288_p7 }
  0x1f   : > { %298 = shalt.err (!%p295_p1)
}
  0x20   : > { %s299_s13 = scalar_lea.vmem %s465_s27, 128  ;;  %s382_s14 = smov [#allocation2]  }
  0x21   : > { %p300_p2 = scmp.ne.s32.totalorder %s465_s27, %s299_s13  ;;  %s304_s16 = sshll.u32 %s382_s14, 4  ;;  %s305_s16 = int_to_ptr.vmem [resolvable:$false] %s304_s16 }
  0x22   : > { %s306_s20 = scalar_lea.vmem %s305_s16, 256  ;;  %p307_p11 = scmp.lt.s32.totalorder %s465_s27, %s305_s16 }
  0x23   : > { %p302_p4 = pnand %p300_p2, %p286_p3  ;;  %p308_p5 = scmp.lt.s32.totalorder %s306_s20, %s299_s13 }
  0x25   : > { %p303_p12 = pneg %p302_p4  ;;  %p309_p8 = por %p308_p5, %p307_p11 }
  0x27   : > { %p310_p9 = pnand %p309_p8, %p303_p12 }
  0x29   : > { %313 = shalt.err (!%p310_p9)
}
  0x2a   : > { %245 = dma.hbm_to_vmem [thread:$0]  (!%p461_p13), %s457_s25, 128, %s465_s27, %s88_s29  }
  0x2b   : > { %p563_p0 = scmp.lt.s32.totalorder %s380_s9, 3  ;;  %p564_p1 = scmp.ge.s32.totalorder %s380_s9, 1 }
  0x2d   : > { %p104_p3 = pnand %p564_p1, %p563_p0 }
  0x2e   : > { %s499_s21 = sand.u32 (!%p104_p3), 1, %s372_s7  }
  0x2f   : > { %107 = sbr.rel (%p104_p3) target bundleno = 81 (0x51), region = 24  ;;  %s232_s22 = sshll.u32 (!%p104_p3), %s499_s21, 3 }
  0x30   : > { %s110_s23 = scalar_lea.sflag (!%p104_p3), [#allocation3], %s499_s21  ;;  %s113_s24 = scalar_lea.vmem (!%p104_p3), [#allocation2], %s232_s22 }
  0x36   : > { %359 = dma.done.wait (%p437_p6), %s110_s23, 128  }
  0x37   : > { %361 = vsyncadd (%p437_p6), %s110_s23, 4294967168  ;;  %v132_v0 = vld [vmem:[%s113_s24] sm:$0xff]  ;;  %s131_s25 = scalar_lea.vmem [#allocation5], %s232_s22  ;;  %s235_s27 = sshll.u32 %s415_s10, 7 }
  0x38   : > { %v133_v1 = vadd.f32 2.0, %v132_v0  ;;  %vm136_vm0 = vcmp.ge.f32.partialorder %v132_v0, 2.0  ;;  %v138_v2 = vand.u32 2147483647, %v132_v0  ;;  %s156_s26 = sshll.u32 %s131_s25, 4  ;;  %s513_s17 = scalar_lea.hbm %s556_s1, %s235_s27  ;;  %s508_s26 = int_to_ptr.vmem [resolvable:$true] %s156_s26 }
  0x39   : > { %v137_v4 = vsel %vm136_vm0, %v132_v0, 0.0  ;;  %s143_s30 = scalar_lea.sflag [#allocation4], %s499_s21  ;;  %s314_s2 = scalar_lea.vmem %s508_s26, 128 }
  0x3a   : > { %v134_v3 = vmul.f32 %v133_v1, %v133_v1  ;;  %vm139_vm1 = vcmp.le.f32.partialorder %v138_v2, 2.0  ;;  %p315_p6 = scmp.ne.s32.totalorder %s508_s26, %s314_s2  ;;  %p565_p11 = scmp.ne.s32.totalorder %s560_s18, 0 }
  0x3b   : > { %s383_s10 = smov [#allocation5]  }
  0x3c   : > { %v135_v5 = vmul.f32 0.125, %v134_v3  ;;  %p316_p12 = pnand %p315_p6, %p565_p11  ;;  %s318_s3 = sshll.u32 %s383_s10, 4  ;;  %s319_s3 = int_to_ptr.vmem [resolvable:$false] %s318_s3 }
  0x3d   : > { %s320_s4 = scalar_lea.vmem %s319_s3, 256  ;;  %p321_p7 = scmp.lt.s32.totalorder %s508_s26, %s319_s3 }
  0x3e   : > { %v140_v6 = vsel %vm139_vm1, %v135_v5, %v137_v4  ;;  %p317_p13 = pneg %p316_p12  ;;  %p322_p10 = scmp.lt.s32.totalorder %s320_s4, %s314_s2 }
  0x3f   : > { %141 = vst [vmem:[%s131_s25] sm:$0xff] %v140_v6 }
  0x40   : > { %p323_p2 = por %p322_p10, %p321_p7 }
  0x42   : > { %p324_p4 = pnand %p323_p2, %p317_p13 }
  0x44   : > { %327 = shalt.err (!%p324_p4)
}
  0x45   : > { %s328_s5 = scalar_lea.hbm %s513_s17, 128  ;;  %s332_s14 = scalar_lea.hbm %s556_s1, 256 }
  0x46   : > { %p329_p5 = scmp.ne.s32.totalorder %s513_s17, %s328_s5  ;;  %p333_p0 = scmp.lt.u32.totalorder %s513_s17, %s556_s1 }
  0x47   : > { %p334_p1 = scmp.lt.u32.totalorder %s332_s14, %s328_s5  ;;  %p336_p6 = scmp.lt.u32.totalorder %s328_s5, %s513_s17 }
  0x48   : > { %p330_p8 = pnand %p329_p5, %p565_p11 }
  0x49   : > { %p335_p3 = por %p334_p1, %p333_p0 }
  0x4a   : > { %p331_p9 = pneg %p330_p8 }
  0x4b   : > { %p337_p12 = por %p336_p6, %p335_p3 }
  0x4d   : > { %p338_p13 = pnand %p337_p12, %p331_p9 }
  0x4f   : > { %341 = shalt.err (!%p338_p13)
}
  0x50   : > { %240 = dma.vmem_to_hbm [thread:$0]  (%p565_p11), %s508_s26, 128, %s513_s17, %s143_s30  }
  0x51 PF: > { %s168_s21 = sand.u32 1, %s368_s6   ;;  %p566_p7 = scmp.ne.s32.totalorder %s561_s19, 0 }
  0x52   : > { %p567_p10 = scmp.ge.s32.totalorder %s380_s9, 2  ;;  %s169_s22 = scalar_lea.sflag [#allocation4], %s168_s21 }
  0x54   : > { %p247_p2 = pnand %p567_p10, %p566_p7 }
  0x56   : > { %363 = dma.done.wait (!%p247_p2), %s169_s22, 128  }
  0x57   : > { %365 = vsyncadd (!%p247_p2), %s169_s22, 4294967168  ;;  %p14_p4 = scmp.ge.s32.totalorder %s419_s12, 4   ;;  %s568_s6 = smov %s372_s7 }
  0x58   : > { %s569_s7 = smov %s376_s8  ;;  %s570_s8 = smov %s431_s15 }
  0x59   : > { %s571_s9 = smov %s419_s12  ;;  %16 = sbr.rel (!%p14_p4) target bundleno = 5 (0x5), region = 69 }
  0x60   :  { %174 = vsyncpa [#allocation3], 1 }
  0x61   :  { %176 = vsyncpa [#allocation3 + $0x1], 1 }
  0x62   :  { %177 = vsyncpa [#allocation4], 1 }
  0x63   :  { %179 = vsyncpa [#allocation4 + $0x1], 1 }

</bundles_post_ra>
